<compile_context>
chip_gen: v6e
topology: v6e:2x2x1
jax: 0.10.0
libtpu: 0.0.40
codegen_flags: <defaults>
</compile_context>

<pallas_src>
import functools

import jax
import jax.numpy as jnp
from jax.experimental import pallas as pl
from jax.experimental.pallas import tpu as pltpu

_LANE = 128
_BLOCK_BYTES = 4 * 1024 * 1024      # ~4 MiB per block (sweet spot per tile sweeps)
_SMALL_RAGGED_COLS = 512            # pad-to-128 threshold for tiny feature maps


def _fused_leaky_relu_kernel(x_ref, b_ref, o_ref, *, pos_scale, neg_scale):
    # x_ref: (tile_rows, tile_cols) block; b_ref: (tile_rows, 1) per-row bias.
    x = x_ref[...]
    y = x + b_ref[...]                              # bias broadcasts along lanes
    pos = jnp.asarray(pos_scale, dtype=y.dtype)
    neg = jnp.asarray(neg_scale, dtype=y.dtype)
    # one select + one mul per element (scale folded into both branches)
    o_ref[...] = (y * jnp.where(y >= 0, pos, neg)).astype(o_ref.dtype)


def _pick_tile(dim, gran, cap):
    """Tile size for `dim`: a multiple of `gran`, <= cap, preferring divisors.

    Never returns more than `cap` (rounded down to a multiple of `gran`), so a
    block can never exceed the byte budget; non-dividing dims rely on a
    pl.cdiv grid with a Pallas-padded edge block.
    """
    cap = max(gran, (cap // gran) * gran)
    if dim <= cap:
        if dim % gran == 0:
            return dim
        return -(-dim // gran) * gran               # round up: one padded block
    t = cap
    while t >= gran:                                # prefer an exact divisor
        if dim % t == 0:
            return t
        t -= gran
    return cap                                      # cdiv grid, padded edge


def fused_leaky_relu(x, bias, negative_slope=0.2, scale=2 ** 0.5):
    """x: (N, C, *spatial) array (PyTorch NCHW convention); bias: (C,)."""
    N, C = x.shape[0], x.shape[1]
    spatial = 1
    for d in x.shape[2:]:
        spatial *= d
    rows, cols = N * C, spatial

    # Free reshape: (N, C, *spatial) is contiguous as (N*C, H*W).
    x2d = x.reshape(rows, cols)
    # Per-row bias: row r = n*C + c -> bias[c]. Tiny array; cast to x's dtype
    # so the kernel computes entirely in the input precision.
    bias_rows = jnp.tile(bias, N).reshape(rows, 1).astype(x.dtype)

    # Small ragged lane widths: pad once (cheap for tiny maps) so every store
    # is lane-dense; slice back afterwards.
    padded_cols = cols
    if cols % _LANE != 0 and cols <= _SMALL_RAGGED_COLS:
        padded_cols = -(-cols // _LANE) * _LANE
        x2d = jnp.pad(x2d, ((0, 0), (0, padded_cols - cols)))

    itemsize = jnp.dtype(x.dtype).itemsize
    sub = {4: 8, 2: 16, 1: 32}.get(itemsize, 8)     # packed sublane granularity

    # Lane (last) dim first: as wide as fits while leaving >= `sub` rows.
    col_cap = _BLOCK_BYTES // (sub * itemsize)
    tile_cols = _pick_tile(padded_cols, _LANE, col_cap)
    # Sublane dim: fill the remaining byte budget.
    row_cap = _BLOCK_BYTES // (tile_cols * itemsize)
    tile_rows = _pick_tile(rows, sub, row_cap)

    # cols innermost so the (tile_rows, 1) bias block is resident across it.
    grid = (pl.cdiv(rows, tile_rows), pl.cdiv(padded_cols, tile_cols))

    kernel = functools.partial(
        _fused_leaky_relu_kernel,
        pos_scale=float(scale),
        neg_scale=float(negative_slope * scale),
    )

    out2d = pl.pallas_call(
        kernel,
        out_shape=jax.ShapeDtypeStruct((rows, padded_cols), x.dtype),
        grid_spec=pltpu.PrefetchScalarGridSpec(
            num_scalar_prefetch=0,
            grid=grid,
            in_specs=[
                pl.BlockSpec((tile_rows, tile_cols), lambda i, j: (i, j)),
                pl.BlockSpec((tile_rows, 1), lambda i, j: (i, 0)),
            ],
            out_specs=pl.BlockSpec((tile_rows, tile_cols), lambda i, j: (i, j)),
        ),
        compiler_params=pltpu.CompilerParams(
            # Both axes parallel -> grid can be sharded across the 2 TCs on v7x.
            dimension_semantics=("parallel", "parallel"),
            vmem_limit_bytes=32 * 1024 * 1024,
        ),
    )(x2d, bias_rows)

    if padded_cols != cols:
        out2d = out2d[:, :cols]
    return out2d.reshape(x.shape)


class FusedLeakyReLU:
    """JAX/Pallas counterpart of the PyTorch module."""

    def __init__(self, channel, negative_slope=0.2, scale=2 ** 0.5):
        # nn.Parameter(torch.zeros(channel)) -> deterministic zero init
        self.bias = jnp.zeros((channel,), dtype=jnp.float32)
        self.negative_slope = negative_slope
        self.scale = scale

    def __call__(self, x):
        return fused_leaky_relu(x, self.bias, self.negative_slope, self.scale)


if __name__ == "__main__":
    key = jax.random.PRNGKey(0)
    N, C, H, W = 2, 4, 16, 16
    kx, kb = jax.random.split(key)
    x = jax.random.normal(kx, (N, C, H, W), dtype=jnp.float32)

    mod = FusedLeakyReLU(C)
    # give the bias a nonzero deterministic value so the add path is exercised
    mod.bias = jax.random.normal(kb, (C,), dtype=jnp.float32)

    out = mod(x)
    jax.block_until_ready(out)

    # reference check in plain JAX
    y = x + mod.bias.reshape(1, C, 1, 1)
    ref = jnp.where(y >= 0, y, y * 0.2) * (2 ** 0.5)
    assert out.shape == (N, C, H, W)
    assert jnp.allclose(out, ref, atol=1e-5, rtol=1e-5)

    # also exercise a lane-ragged spatial size (pad-to-128 path)
    x2 = jax.random.normal(key, (2, 4, 7, 7), dtype=jnp.float32)
    out2 = mod(x2)
    jax.block_until_ready(out2)
    y2 = x2 + mod.bias.reshape(1, C, 1, 1)
    ref2 = jnp.where(y2 >= 0, y2, y2 * 0.2) * (2 ** 0.5)
    assert jnp.allclose(out2, ref2, atol=1e-5, rtol=1e-5)

    print("KERNEL_OK")
</pallas_src>

<mosaic_0001>
module attributes {stable_mosaic.version = 11 : i64} {
  func.func @_fused_leaky_relu_kernel(%arg0: i32, %arg1: i32, %arg2: memref<8x256xf32, #tpu.memory_space<vmem>>, %arg3: memref<8x1xf32, #tpu.memory_space<vmem>>, %arg4: memref<8x256xf32, #tpu.memory_space<vmem>>) attributes {dimension_semantics = [#tpu.dimension_semantics<parallel>, #tpu.dimension_semantics<parallel>], iteration_bounds = array<i64: 1, 1>, scalar_prefetch = 0 : i64, scratch_operands = 0 : i64, tpu.core_type = #tpu.core_type<tc>, window_params = [{transform_indices = @transform_0, window_bounds = array<i64: 8, 256>}, {transform_indices = @transform_1, window_bounds = array<i64: 8, 1>}, {transform_indices = @transform_2, window_bounds = array<i64: 8, 256>}]} {
    %c0 = arith.constant 0 : index
    %c0_0 = arith.constant 0 : index
    %0 = vector.load %arg2[%c0, %c0_0] : memref<8x256xf32, #tpu.memory_space<vmem>>, vector<8x256xf32>
    %c0_1 = arith.constant 0 : index
    %c0_2 = arith.constant 0 : index
    %1 = vector.load %arg3[%c0_1, %c0_2] : memref<8x1xf32, #tpu.memory_space<vmem>>, vector<8x1xf32>
    %2 = vector.broadcast %1 : vector<8x1xf32> to vector<8x256xf32>
    %3 = arith.addf %0, %2 : vector<8x256xf32>
    %cst = arith.constant 0.000000e+00 : f32
    %4 = vector.broadcast %cst : f32 to vector<8x256xf32>
    %5 = arith.cmpf oge, %3, %4 : vector<8x256xf32>
    %cst_3 = arith.constant 1.41421354 : f32
    %cst_4 = arith.constant 0.282842726 : f32
    %6 = vector.broadcast %cst_3 : f32 to vector<8x256xf32>
    %7 = vector.broadcast %cst_4 : f32 to vector<8x256xf32>
    %8 = arith.select %5, %6, %7 : vector<8x256xi1>, vector<8x256xf32>
    %9 = arith.mulf %3, %8 : vector<8x256xf32>
    %c0_5 = arith.constant 0 : index
    %c0_6 = arith.constant 0 : index
    %10 = vector.load %arg4[%c0_5, %c0_6] : memref<8x256xf32, #tpu.memory_space<vmem>>, vector<8x256xf32>
    tpu.vector_store %arg4[%c0_5, %c0_6], %9 {strides = array<i32>} : memref<8x256xf32, #tpu.memory_space<vmem>>, vector<8x256xf32>,
    return
  }
  func.func @transform_0(%arg0: i32, %arg1: i32) -> (i32, i32) {
    %c0_i32 = arith.constant 0 : i32
    return %arg0, %arg1 : i32, i32
  }
  func.func @transform_1(%arg0: i32, %arg1: i32) -> (i32, i32) {
    %c0_i32 = arith.constant 0 : i32
    %c0_i32_0 = arith.constant 0 : i32
    return %arg0, %c0_i32 : i32, i32
  }
  func.func @transform_2(%arg0: i32, %arg1: i32) -> (i32, i32) {
    %c0_i32 = arith.constant 0 : i32
    return %arg0, %arg1 : i32, i32
  }
}

</mosaic_0001>

<bundles_post_ra>
// kernel: tpu_custom_call.1
= control target key start
LH: loop header
LB: loop body
LE: loop exit
PB: predicated region body
PF: predicated region fallthrough
CT: control target
= control target key end

     0   :  { %7 = vsyncpa [#allocation3], 0  ;;  %s134_s0 = inlined_call_operand.hbm [shape: f32[8,256], index: 0, kind: input, shape index: {}]   ;;  %s135_s1 = inlined_call_operand.vmem [shape: f32[8,1], index: 1, kind: input, shape index: {}]   ;;  %s136_s2 = inlined_call_operand.hbm [shape: f32[8,256], index: 2, kind: output, shape index: {}]  }
   0x1   :  { %8 = vsyncpa [#allocation4], 0  ;;  %s106_s9 = smov [#allocation2]  }
   0x2   :  { %s15_s10 = sshll.u32 %s106_s9, 4  ;;  %s16_s10 = int_to_ptr.vmem [resolvable:$true] %s15_s10 }
   0x3   :  { %s70_s11 = scalar_lea.vmem %s16_s10, 256  ;;  %p75_p1 = scmp.lt.s32.totalorder %s16_s10, %s16_s10 }
   0x4   :  { %p71_p0 = scmp.ne.s32.totalorder %s16_s10, %s70_s11  ;;  %p76_p2 = scmp.lt.s32.totalorder %s70_s11, %s70_s11 }
   0x6   :  { %p77_p3 = por %p76_p2, %p75_p1 }
   0x8   :  { %p78_p4 = pnand %p77_p3, %p71_p0 }
   0xa   :  { %81 = shalt.err (!%p78_p4)
}
   0xb   :  { %18 = dma.hbm_to_vmem [thread:$0]  %s134_s0, 256, %s16_s10, [#allocation3]  }
   0xc   :  { %102 = dma.done.wait [#allocation3], 256  }
   0xd   :  { %103 = vsyncadd [#allocation3], 4294967040  ;;  %v107_v0 = vmov 0   ;;  %v26_v1 = vld [vmem:[%s135_s1] sm:$0xff]  ;;  %v25_v3 = vld [vmem:[#allocation2 + $0x8] sm:$0xff]  ;;  %s108_s16 = smov [#allocation5]  }
   0xe   :  { %61 = vset.pattern.permute.xlu0 %v107_v0  ;;  %v24_v2 = vld [vmem:[#allocation2] sm:$0xff]  ;;  %s48_s17 = sshll.u32 %s108_s16, 4  ;;  %v109_v7 = vmov 0.28284273   ;;  %s49_s17 = int_to_ptr.vmem [resolvable:$true] %s48_s17 }
   0xf   :  { %29 = vperm.xlu0 %61, %v26_v1   ;;  %s82_s0 = scalar_lea.vmem %s49_s17, 256  ;;  %p87_p6 = scmp.lt.s32.totalorder %s49_s17, %s49_s17 }
  0x10   :  { %p83_p5 = scmp.ne.s32.totalorder %s49_s17, %s82_s0  ;;  %p88_p7 = scmp.lt.s32.totalorder %s82_s0, %s82_s0 }
  0x12   :  { %p89_p8 = por %p88_p7, %p87_p6 }
  0x14   :  { %p90_p9 = pnand %p89_p8, %p83_p5 }
  0x8a   :  { %v30_v4 = vpop.permute.xlu0 %29 }
  0x8b   :  { %v32_v5 = vadd.f32 %v30_v4, %v24_v2  ;;  %v33_v6 = vadd.f32 %v30_v4, %v25_v3 }
  0x8d   :  { %vm34_vm0 = vcmp.ge.f32.partialorder %v32_v5, 0.0  ;;  %vm35_vm1 = vcmp.ge.f32.partialorder %v33_v6, 0.0 }
  0x8e   :  { %v36_v8 = vsel %vm34_vm0, 1.4142135, %v109_v7  ;;  %v37_v9 = vsel %vm35_vm1, 1.4142135, %v109_v7 }
  0x8f   :  { %v38_v10 = vmul.f32 %v36_v8, %v32_v5  ;;  %v39_v11 = vmul.f32 %v37_v9, %v33_v6 }
  0x91   :  { %40 = vst [vmem:[#allocation5] sm:$0xff] %v38_v10  ;;  %41 = vst [vmem:[#allocation5 + $0x8] sm:$0xff] %v39_v11 }
  0x92   :  { %93 = shalt.err (!%p90_p9)
}
  0x93   :  { %51 = dma.vmem_to_hbm [thread:$0]  %s49_s17, 256, %s136_s2, [#allocation4]  }
  0x94   :  { %104 = dma.done.wait [#allocation4], 256  }
  0x95   :  { %105 = vsyncadd [#allocation4], 4294967040 }
  0x96   :  { %55 = vsyncpa [#allocation3], 1 }
  0x97   :  { %56 = vsyncpa [#allocation4], 1 }

</bundles_post_ra>
